<compile_context>
chip_gen: v6e
topology: v6e:2x2x1
jax: 0.10.0
libtpu: 0.0.40
codegen_flags: <defaults>
</compile_context>

<pallas_src>
import jax
import jax.numpy as jnp
from jax.experimental import pallas as pl
from jax.experimental.pallas import tpu as pltpu


def _leaky_relu(x, slope=0.01):
    return jnp.where(x > 0, x, slope * x)


def abstraction_kernel(x_ref, w1_ref, b1_ref, w2_ref, b2_ref, w3_ref, b3_ref, o_ref):
    # Hot path: 3 bf16 MXU matmuls (f32 accumulate) + VPU elementwise + softmax.
    x = x_ref[...].astype(jnp.bfloat16)                                   # (tb, obs)

    h1 = jnp.dot(x, w1_ref[...], preferred_element_type=jnp.float32)     # (tb, 128)
    h1 = _leaky_relu(h1 + b1_ref[...])

    h2 = jnp.dot(h1.astype(jnp.bfloat16), w2_ref[...],
                 preferred_element_type=jnp.float32)                     # (tb, 256)
    h2 = _leaky_relu(h2 + b2_ref[...])

    logits = jnp.dot(h2.astype(jnp.bfloat16), w3_ref[...],
                     preferred_element_type=jnp.float32)                 # (tb, A)
    logits = logits + b3_ref[...]

    # Numerically-stable softmax over last dim, + 0.1**16 as in the reference.
    m = jnp.max(logits, axis=-1, keepdims=True)        # XLU (free slot)
    e = jnp.exp(logits - m)                            # EUP
    s = jnp.sum(e, axis=-1, keepdims=True)             # XLU
    inv = pl.reciprocal(s, approx=True)                # EUP (free next to exp)
    inv = inv * (2.0 - s * inv)                        # one Newton step -> ~f32-exact
    o_ref[...] = (e * inv + 1e-16).astype(o_ref.dtype)


def _round_up(x, m):
    return ((x + m - 1) // m) * m


def _choose_tile_b(B, max_tile=512):
    """Sublane-aligned batch tile.

    Small batches run as one grid step (per-step overhead ~0.35us dominates a
    tiny MLP tile).  Large batches are capped at `max_tile` so input/output
    DMAs double-buffer against compute and v7x's two TensorCores each get work.
    """
    return max(8, min(max_tile, _round_up(B, 8)))


def abstraction_forward(obs, params, *, max_tile_b=512):
    """obs: (B, obs_size) float32. params: dict of w1,b1,w2,b2,w3,b3 (float32)."""
    B, obs_size = obs.shape
    A = params["w3"].shape[1]

    tile_b = _choose_tile_b(B, max_tile_b)
    B_pad = _round_up(B, tile_b)
    x = obs if B_pad == B else jnp.pad(obs, ((0, B_pad - B), (0, 0)))

    # Weights cast to bf16 once here (native MXU dtype); biases stay f32 and
    # are added on the f32 accumulator.
    w1 = params["w1"].astype(jnp.bfloat16)
    w2 = params["w2"].astype(jnp.bfloat16)
    w3 = params["w3"].astype(jnp.bfloat16)
    b1 = params["b1"].reshape(1, -1).astype(jnp.float32)
    b2 = params["b2"].reshape(1, -1).astype(jnp.float32)
    b3 = params["b3"].reshape(1, -1).astype(jnp.float32)

    grid = (B_pad // tile_b,)

    def rep(arr):
        # Constant block index across the batch grid axis -> stays resident in
        # VMEM (Pallas skips the re-DMA when the block index is unchanged).
        return pl.BlockSpec(arr.shape, lambda i: (0,) * arr.ndim)

    out = pl.pallas_call(
        abstraction_kernel,
        out_shape=jax.ShapeDtypeStruct((B_pad, A), jnp.float32),
        grid=grid,
        in_specs=[
            pl.BlockSpec((tile_b, obs_size), lambda i: (i, 0)),
            rep(w1), rep(b1), rep(w2), rep(b2), rep(w3), rep(b3),
        ],
        out_specs=pl.BlockSpec((tile_b, A), lambda i: (i, 0)),
        compiler_params=pltpu.CompilerParams(
            dimension_semantics=("parallel",),
            vmem_limit_bytes=32 * 1024 * 1024,  # >= v5e's 16 MiB scoped default
        ),
    )(x, w1, b1, w2, b2, w3, b3)

    return out[:B] if B_pad != B else out


def init_params(key, obs_size, num_abstract_states):
    """Deterministic init mimicking nn.Linear default (uniform +/- 1/sqrt(fan_in))."""
    dims = [(obs_size, 128), (128, 256), (256, num_abstract_states)]
    params = {}
    for idx, (fan_in, fan_out) in enumerate(dims, start=1):
        key, kw, kb = jax.random.split(key, 3)
        bound = 1.0 / jnp.sqrt(fan_in)
        params[f"w{idx}"] = jax.random.uniform(
            kw, (fan_in, fan_out), jnp.float32, -bound, bound)
        params[f"b{idx}"] = jax.random.uniform(
            kb, (fan_out,), jnp.float32, -bound, bound)
    return params


def reference_forward_f32(obs, params):
    h = obs @ params["w1"] + params["b1"]
    h = jnp.where(h > 0, h, 0.01 * h)
    h = h @ params["w2"] + params["b2"]
    h = jnp.where(h > 0, h, 0.01 * h)
    logits = h @ params["w3"] + params["b3"]
    return jax.nn.softmax(logits, axis=-1) + 1e-16


def reference_forward_bf16(obs, params):
    """Mirrors the kernel's bf16-operand / f32-accumulate arithmetic."""
    bf = jnp.bfloat16
    h = jnp.dot(obs.astype(bf), params["w1"].astype(bf),
                preferred_element_type=jnp.float32) + params["b1"]
    h = jnp.where(h > 0, h, 0.01 * h)
    h = jnp.dot(h.astype(bf), params["w2"].astype(bf),
                preferred_element_type=jnp.float32) + params["b2"]
    h = jnp.where(h > 0, h, 0.01 * h)
    logits = jnp.dot(h.astype(bf), params["w3"].astype(bf),
                     preferred_element_type=jnp.float32) + params["b3"]
    return jax.nn.softmax(logits, axis=-1) + 1e-16


if __name__ == "__main__":
    B = 8
    obs_size = 32
    num_abstract_states = 8

    key = jax.random.PRNGKey(0)
    key, k_obs = jax.random.split(key)
    obs = jax.random.normal(k_obs, (B, obs_size), jnp.float32)
    params = init_params(key, obs_size, num_abstract_states)

    out = abstraction_forward(obs, params)
    out = jax.block_until_ready(out)
    assert out.shape == (B, num_abstract_states)

    # Tight check against a reference using the same bf16-operand arithmetic.
    ref_bf16 = reference_forward_bf16(obs, params)
    assert jnp.allclose(out, ref_bf16, atol=1e-5, rtol=1e-5), \
        "mismatch vs bf16-matmul JAX reference"

    # Loose check against the full-f32 reference (bf16 operands round logits).
    ref_f32 = reference_forward_f32(obs, params)
    assert jnp.allclose(out, ref_f32, atol=2e-2, rtol=2e-2), \
        "mismatch vs f32 JAX reference"

    # Output rows are valid probability distributions.
    assert jnp.allclose(jnp.sum(out, axis=-1), 1.0, atol=1e-4)

    # Also exercise a batch that forces padding + a multi-step grid.
    B2 = 100
    key, k_obs2 = jax.random.split(key)
    obs2 = jax.random.normal(k_obs2, (B2, obs_size), jnp.float32)
    out2 = jax.block_until_ready(abstraction_forward(obs2, params, max_tile_b=64))
    assert out2.shape == (B2, num_abstract_states)
    assert jnp.allclose(out2, reference_forward_bf16(obs2, params), atol=1e-5, rtol=1e-5)

    print("KERNEL_OK")
</pallas_src>

<mosaic_0001>
module attributes {stable_mosaic.version = 11 : i64} {
  func.func @abstraction_kernel(%arg0: i32, %arg1: memref<8x32xf32, #tpu.memory_space<vmem>>, %arg2: memref<32x128xbf16, #tpu.memory_space<vmem>>, %arg3: memref<1x128xf32, #tpu.memory_space<vmem>>, %arg4: memref<128x256xbf16, #tpu.memory_space<vmem>>, %arg5: memref<1x256xf32, #tpu.memory_space<vmem>>, %arg6: memref<256x8xbf16, #tpu.memory_space<vmem>>, %arg7: memref<1x8xf32, #tpu.memory_space<vmem>>, %arg8: memref<8x8xf32, #tpu.memory_space<vmem>>) attributes {dimension_semantics = [#tpu.dimension_semantics<parallel>], iteration_bounds = array<i64: 1>, scalar_prefetch = 0 : i64, scratch_operands = 0 : i64, tpu.core_type = #tpu.core_type<tc>, window_params = [{transform_indices = @transform_0, window_bounds = array<i64: 8, 32>}, {pipeline_mode = #tpu.pipeline_mode<synchronous>, transform_indices = @transform_1, window_bounds = array<i64: 32, 128>}, {pipeline_mode = #tpu.pipeline_mode<synchronous>, transform_indices = @transform_2, window_bounds = array<i64: 1, 128>}, {pipeline_mode = #tpu.pipeline_mode<synchronous>, transform_indices = @transform_3, window_bounds = array<i64: 128, 256>}, {pipeline_mode = #tpu.pipeline_mode<synchronous>, transform_indices = @transform_4, window_bounds = array<i64: 1, 256>}, {pipeline_mode = #tpu.pipeline_mode<synchronous>, transform_indices = @transform_5, window_bounds = array<i64: 256, 8>}, {pipeline_mode = #tpu.pipeline_mode<synchronous>, transform_indices = @transform_6, window_bounds = array<i64: 1, 8>}, {transform_indices = @transform_7, window_bounds = array<i64: 8, 8>}]} {
    %c0 = arith.constant 0 : index
    %c0_0 = arith.constant 0 : index
    %0 = vector.load %arg1[%c0, %c0_0] : memref<8x32xf32, #tpu.memory_space<vmem>>, vector<8x32xf32>
    %1 = arith.truncf %0 : vector<8x32xf32> to vector<8x32xbf16>
    %c0_1 = arith.constant 0 : index
    %c0_2 = arith.constant 0 : index
    %2 = vector.load %arg2[%c0_1, %c0_2] : memref<32x128xbf16, #tpu.memory_space<vmem>>, vector<32x128xbf16>
    %cst = arith.constant dense<0.000000e+00> : vector<8x128xf32>
    %3 = tpu.matmul %1, %2, %cst {dimension_numbers = #tpu.dot_dimension_numbers<[1], [0], [0], [1], [0, 0, 1, 1], [], []>} : vector<8x32xbf16>, vector<32x128xbf16>, vector<8x128xf32> -> vector<8x128xf32>
    %c0_3 = arith.constant 0 : index
    %c0_4 = arith.constant 0 : index
    %4 = vector.load %arg3[%c0_3, %c0_4] : memref<1x128xf32, #tpu.memory_space<vmem>>, vector<1x128xf32>
    %5 = vector.broadcast %4 : vector<1x128xf32> to vector<8x128xf32>
    %6 = arith.addf %3, %5 : vector<8x128xf32>
    %cst_5 = arith.constant 0.000000e+00 : f32
    %7 = vector.broadcast %cst_5 : f32 to vector<8x128xf32>
    %8 = arith.cmpf ogt, %6, %7 : vector<8x128xf32>
    %cst_6 = arith.constant 0.00999999977 : f32
    %9 = vector.broadcast %cst_6 : f32 to vector<8x128xf32>
    %10 = arith.mulf %9, %6 : vector<8x128xf32>
    %11 = arith.select %8, %6, %10 : vector<8x128xi1>, vector<8x128xf32>
    %12 = arith.truncf %11 : vector<8x128xf32> to vector<8x128xbf16>
    %c0_7 = arith.constant 0 : index
    %c0_8 = arith.constant 0 : index
    %13 = vector.load %arg4[%c0_7, %c0_8] : memref<128x256xbf16, #tpu.memory_space<vmem>>, vector<128x256xbf16>
    %cst_9 = arith.constant dense<0.000000e+00> : vector<8x256xf32>
    %14 = tpu.matmul %12, %13, %cst_9 {dimension_numbers = #tpu.dot_dimension_numbers<[1], [0], [0], [1], [0, 0, 1, 1], [], []>} : vector<8x128xbf16>, vector<128x256xbf16>, vector<8x256xf32> -> vector<8x256xf32>
    %c0_10 = arith.constant 0 : index
    %c0_11 = arith.constant 0 : index
    %15 = vector.load %arg5[%c0_10, %c0_11] : memref<1x256xf32, #tpu.memory_space<vmem>>, vector<1x256xf32>
    %16 = vector.broadcast %15 : vector<1x256xf32> to vector<8x256xf32>
    %17 = arith.addf %14, %16 : vector<8x256xf32>
    %cst_12 = arith.constant 0.000000e+00 : f32
    %18 = vector.broadcast %cst_12 : f32 to vector<8x256xf32>
    %19 = arith.cmpf ogt, %17, %18 : vector<8x256xf32>
    %cst_13 = arith.constant 0.00999999977 : f32
    %20 = vector.broadcast %cst_13 : f32 to vector<8x256xf32>
    %21 = arith.mulf %20, %17 : vector<8x256xf32>
    %22 = arith.select %19, %17, %21 : vector<8x256xi1>, vector<8x256xf32>
    %23 = arith.truncf %22 : vector<8x256xf32> to vector<8x256xbf16>
    %c0_14 = arith.constant 0 : index
    %c0_15 = arith.constant 0 : index
    %24 = vector.load %arg6[%c0_14, %c0_15] : memref<256x8xbf16, #tpu.memory_space<vmem>>, vector<256x8xbf16>
    %cst_16 = arith.constant dense<0.000000e+00> : vector<8x8xf32>
    %25 = tpu.matmul %23, %24, %cst_16 {dimension_numbers = #tpu.dot_dimension_numbers<[1], [0], [0], [1], [0, 0, 1, 1], [], []>} : vector<8x256xbf16>, vector<256x8xbf16>, vector<8x8xf32> -> vector<8x8xf32>
    %c0_17 = arith.constant 0 : index
    %c0_18 = arith.constant 0 : index
    %26 = vector.load %arg7[%c0_17, %c0_18] : memref<1x8xf32, #tpu.memory_space<vmem>>, vector<1x8xf32>
    %27 = vector.broadcast %26 : vector<1x8xf32> to vector<8x8xf32>
    %28 = arith.addf %25, %27 : vector<8x8xf32>
    %cst_19 = arith.constant dense<0xFF800000> : vector<8xf32>
    %29 = vector.multi_reduction <maximumf>, %28, %cst_19 [1] : vector<8x8xf32> to vector<8xf32>
    %30 = vector.shape_cast %29 : vector<8xf32> to vector<8x1xf32>
    %31 = vector.broadcast %30 : vector<8x1xf32> to vector<8x8xf32>
    %32 = arith.subf %28, %31 : vector<8x8xf32>
    %33 = math.exp %32 : vector<8x8xf32>
    %cst_20 = arith.constant dense<0.000000e+00> : vector<8xf32>
    %34 = vector.multi_reduction <add>, %33, %cst_20 [1] : vector<8x8xf32> to vector<8xf32>
    %35 = vector.shape_cast %34 : vector<8xf32> to vector<8x1xf32>
    %36 = tpu.reciprocal %35 {approx = true} : vector<8x1xf32> -> vector<8x1xf32>
    %37 = arith.mulf %35, %36 : vector<8x1xf32>
    %cst_21 = arith.constant 2.000000e+00 : f32
    %38 = vector.broadcast %cst_21 : f32 to vector<8x1xf32>
    %39 = arith.subf %38, %37 : vector<8x1xf32>
    %40 = arith.mulf %36, %39 : vector<8x1xf32>
    %41 = vector.broadcast %40 : vector<8x1xf32> to vector<8x8xf32>
    %42 = arith.mulf %33, %41 : vector<8x8xf32>
    %cst_22 = arith.constant 1.000000e-16 : f32
    %43 = vector.broadcast %cst_22 : f32 to vector<8x8xf32>
    %44 = arith.addf %42, %43 : vector<8x8xf32>
    %c0_23 = arith.constant 0 : index
    %c0_24 = arith.constant 0 : index
    %45 = vector.load %arg8[%c0_23, %c0_24] : memref<8x8xf32, #tpu.memory_space<vmem>>, vector<8x8xf32>
    tpu.vector_store %arg8[%c0_23, %c0_24], %44 {strides = array<i32>} : memref<8x8xf32, #tpu.memory_space<vmem>>, vector<8x8xf32>,
    return
  }
  func.func @transform_0(%arg0: i32) -> (i32, i32) {
    %c0_i32 = arith.constant 0 : i32
    %c0_i32_0 = arith.constant 0 : i32
    return %arg0, %c0_i32 : i32, i32
  }
  func.func @transform_1(%arg0: i32) -> (i32, i32) {
    %c0_i32 = arith.constant 0 : i32
    %c0_i32_0 = arith.constant 0 : i32
    %c0_i32_1 = arith.constant 0 : i32
    return %c0_i32, %c0_i32_0 : i32, i32
  }
  func.func @transform_2(%arg0: i32) -> (i32, i32) {
    %c0_i32 = arith.constant 0 : i32
    %c0_i32_0 = arith.constant 0 : i32
    %c0_i32_1 = arith.constant 0 : i32
    return %c0_i32, %c0_i32_0 : i32, i32
  }
  func.func @transform_3(%arg0: i32) -> (i32, i32) {
    %c0_i32 = arith.constant 0 : i32
    %c0_i32_0 = arith.constant 0 : i32
    %c0_i32_1 = arith.constant 0 : i32
    return %c0_i32, %c0_i32_0 : i32, i32
  }
  func.func @transform_4(%arg0: i32) -> (i32, i32) {
    %c0_i32 = arith.constant 0 : i32
    %c0_i32_0 = arith.constant 0 : i32
    %c0_i32_1 = arith.constant 0 : i32
    return %c0_i32, %c0_i32_0 : i32, i32
  }
  func.func @transform_5(%arg0: i32) -> (i32, i32) {
    %c0_i32 = arith.constant 0 : i32
    %c0_i32_0 = arith.constant 0 : i32
    %c0_i32_1 = arith.constant 0 : i32
    return %c0_i32, %c0_i32_0 : i32, i32
  }
  func.func @transform_6(%arg0: i32) -> (i32, i32) {
    %c0_i32 = arith.constant 0 : i32
    %c0_i32_0 = arith.constant 0 : i32
    %c0_i32_1 = arith.constant 0 : i32
    return %c0_i32, %c0_i32_0 : i32, i32
  }
  func.func @transform_7(%arg0: i32) -> (i32, i32) {
    %c0_i32 = arith.constant 0 : i32
    %c0_i32_0 = arith.constant 0 : i32
    return %arg0, %c0_i32 : i32, i32
  }
}

</mosaic_0001>

<bundles_post_ra>
// kernel: tpu_custom_call.1
= control target key start
LH: loop header
LB: loop body
LE: loop exit
PB: predicated region body
PF: predicated region fallthrough
CT: control target
= control target key end

     0   :  { %12 = vsyncpa [#allocation3], 0  ;;  %s847_s0 = inlined_call_operand.vmem [shape: f32[8,32], index: 0, kind: input, shape index: {}]   ;;  %s848_s1 = inlined_call_operand.hbm [shape: bf16[32,128], index: 1, kind: input, shape index: {}]   ;;  %s849_s2 = inlined_call_operand.vmem [shape: f32[1,128], index: 2, kind: input, shape index: {}]   ;;  %s850_s3 = inlined_call_operand.vmem [shape: bf16[128,256], index: 3, kind: input, shape index: {}]   ;;  %s851_s4 = inlined_call_operand.hbm [shape: f32[1,256], index: 4, kind: input, shape index: {}]   ;;  %s852_s5 = inlined_call_operand.vmem [shape: bf16[256,8], index: 5, kind: input, shape index: {}]   ;;  %s853_s6 = inlined_call_operand.vmem [shape: f32[1,8], index: 6, kind: input, shape index: {}]   ;;  %s854_s7 = inlined_call_operand.hbm [shape: f32[8,8], index: 7, kind: output, shape index: {}]  }
   0x1   :  { %13 = vsyncpa [#allocation6], 0 }
   0x2   :  { %14 = vsyncpa [#allocation4], 0  ;;  %s682_s24 = smov [#allocation2]  }
   0x3   :  { %s22_s25 = sshll.u32 %s682_s24, 4  ;;  %s23_s25 = int_to_ptr.vmem [resolvable:$true] %s22_s25 }
   0x4   :  { %s624_s26 = scalar_lea.vmem %s23_s25, 256  ;;  %p629_p1 = scmp.lt.s32.totalorder %s23_s25, %s23_s25 }
   0x5   :  { %p625_p0 = scmp.ne.s32.totalorder %s23_s25, %s624_s26  ;;  %p630_p2 = scmp.lt.s32.totalorder %s624_s26, %s624_s26 }
   0x7   :  { %p631_p3 = por %p630_p2, %p629_p1 }
   0x9   :  { %p632_p4 = pnand %p631_p3, %p625_p0 }
   0xb   :  { %635 = shalt.err (!%p632_p4)
}
   0xc   :  { %s683_s27 = smov 64   ;;  %s684_s28 = smov 4  }
   0xd   :  { %28 = dma.hbm_to_vmem [thread:$0]  %s848_s1, 256, %s23_s25, [#allocation3], %s683_s27, %s683_s27, %s684_s28  }
   0xe   :  { %s685_s8 = smov [#allocation5]  }
   0xf   :  { %s39_s9 = sshll.u32 %s685_s8, 4  ;;  %s40_s9 = int_to_ptr.vmem [resolvable:$true] %s39_s9 }
  0x10   :  { %s644_s10 = scalar_lea.vmem %s40_s9, 32  ;;  %p649_p6 = scmp.lt.s32.totalorder %s40_s9, %s40_s9 }
  0x11   :  { %p645_p5 = scmp.ne.s32.totalorder %s40_s9, %s644_s10  ;;  %p650_p7 = scmp.lt.s32.totalorder %s644_s10, %s644_s10 }
  0x13   :  { %p651_p8 = por %p650_p7, %p649_p6 }
  0x15   :  { %p652_p9 = pnand %p651_p8, %p645_p5 }
  0x17   :  { %655 = shalt.err (!%p652_p9)
}
  0x18   :  { %42 = dma.hbm_to_vmem [thread:$0]  %s851_s4, 32, %s40_s9, [#allocation6]  }
  0x19   :  { %676 = dma.done.wait [#allocation3], 256  }
  0x1a   :  { %677 = vsyncadd [#allocation3], 4294967040 }
  0x1b   :  { %678 = dma.done.wait [#allocation6], 32  }
  0x1c   :  { %679 = vsyncadd [#allocation6], 4294967264  ;;  %v686_v0 = vmov 0.0   ;;  %vm687_vm0 = vmmov 0   ;;  %v570_v1 = vld [vmem:[#allocation2 + $0x8] sm:$0xff]   ;;  %v571_v2 = vld [vmem:[#allocation2] sm:$0xff]   ;;  %v145_v47 = vlaneseq }
  0x1d   :  { %554 = vmatprep.subr.bf16.mxu0 %v686_v0  ;;  %558 = vmatprep.mubr.msk.bf16.mxu0 %vm687_vm0, %v686_v0  ;;  %v54_v3 = vld [vmem:[%s847_s0] sm:$0xff]  ;;  %v572_v4 = vld [vmem:[%s850_s3 + $0x74] ss:$8 sps:$4 sm:$0xff]   ;;  %v574_v5 = vld [vmem:[%s850_s3 + $0x70] ss:$8 sps:$4 sm:$0xff]   ;;  %vm79_vm1 = vcmask 261120  }
  0x1e   :  { %555 = vmatpush3.bf16.msra.mxu0 %v570_v1  ;;  %v575_v6 = vld [vmem:[%s850_s3 + $0x64] ss:$8 sps:$4 sm:$0xff]   ;;  %v55_v7 = vpack.c.bf16 %v54_v3, %v54_v3  ;;  %235 = vmatprep.subr.bf16.mxu1 %v572_v4  ;;  %v577_v8 = vld [vmem:[%s850_s3 + $0x60] ss:$8 sps:$4 sm:$0xff]   ;;  %v578_v9 = vld [vmem:[%s850_s3 + $0x54] ss:$8 sps:$4 sm:$0xff]  }
  0x1f   :  { %556 = vmatprep.subr.bf16.mxu0 %v686_v0  ;;  %236 = vmatpush1.bf16.msra.mxu1 %v574_v5  ;;  %v580_v10 = vld [vmem:[%s850_s3 + $0x50] ss:$8 sps:$4 sm:$0xff]   ;;  %v581_v11 = vld [vmem:[%s850_s3 + $0x44] ss:$8 sps:$4 sm:$0xff]   ;;  %v583_v12 = vld [vmem:[%s850_s3 + $0x40] ss:$8 sps:$4 sm:$0xff]  }
  0x20   :  { %237 = vmatprep.subr.bf16.mxu1 %v575_v6  ;;  %v584_v13 = vld [vmem:[%s850_s3 + $0x34] ss:$8 sps:$4 sm:$0xff]   ;;  %v586_v14 = vld [vmem:[%s850_s3 + $0x30] ss:$8 sps:$4 sm:$0xff]   ;;  %v587_v15 = vld [vmem:[%s850_s3 + $0x24] ss:$8 sps:$4 sm:$0xff]  }
  0x21   :  { %v589_v16 = vld [vmem:[%s850_s3 + $0x20] ss:$8 sps:$4 sm:$0xff]   ;;  %v590_v17 = vld [vmem:[%s850_s3 + $0x14] ss:$8 sps:$4 sm:$0xff]   ;;  %v592_v18 = vld [vmem:[%s850_s3 + $0x10] ss:$8 sps:$4 sm:$0xff]  }
  0x22   :  { %557 = vmatpush3.bf16.msra.mxu0 %v571_v2  ;;  %v593_v19 = vld [vmem:[%s850_s3 + $0x4] ss:$8 sps:$4 sm:$0xff]   ;;  %v595_v20 = vld [vmem:[%s850_s3] ss:$8 sps:$4 sm:$0xff]   ;;  %v688_v21 = vmov 0   ;;  %v596_v22 = vld [vmem:[%s852_s5 + $0x78] sm:$0xff]  }
  0x23   :  { %238 = vmatpush1.bf16.msra.mxu1 %v577_v8  ;;  %267 = vmatprep.mubr.bf16.mxu1 %v688_v21  ;;  %v597_v23 = vld [vmem:[%s852_s5 + $0x38] sm:$0xff]   ;;  %v598_v24 = vld [vmem:[%s852_s5 + $0x70] sm:$0xff]   ;;  %v600_v26 = vld [vmem:[%s852_s5 + $0x68] sm:$0xff]   ;;  %v146_v48 = vshrl.u32 %v145_v47, 7  ;;  %vm459_vm5 = vcmask 64512  }
  0x24   :  { %239 = vmatprep.subr.bf16.mxu1 %v578_v9  ;;  %532 = vmatprep.subr.bf16.mxu0 %v596_v22  ;;  %v599_v25 = vld [vmem:[%s852_s5 + $0x30] sm:$0xff]   ;;  %v601_v27 = vld [vmem:[%s852_s5 + $0x28] sm:$0xff]   ;;  %v602_v28 = vld [vmem:[%s852_s5 + $0x60] sm:$0xff]  }
  0x25   :  { %559 = vmatmul.mubr.msk.bf16.vlgmr.msra.gmra.mxu0 %vm79_vm1, %v55_v7  ;;  %v603_v29 = vld [vmem:[%s852_s5 + $0x20] sm:$0xff]   ;;  %v604_v30 = vld [vmem:[%s852_s5 + $0x58] sm:$0xff]   ;;  %v606_v32 = vld [vmem:[%s852_s5 + $0x50] sm:$0xff]   ;;  %v147_v49 = vsub.s32 0, %v146_v48  ;;  %v151_v51 = vsub.s32 1, %v146_v48 }
  0x26   :  { %533 = vmatpush3.bf16.msra.mxu0 %v597_v23  ;;  %v605_v31 = vld [vmem:[%s852_s5 + $0x18] sm:$0xff]   ;;  %v492_v33 = vld [vmem:[%s849_s2] ss:$0 sm:$0xff]  ;;  %v607_v42 = vld [vmem:[%s852_s5 + $0x10] sm:$0xff]  }
  0x27   :  { %240 = vmatpush1.bf16.msra.mxu1 %v580_v10  ;;  %534 = vmatprep.subr.bf16.mxu0 %v598_v24  ;;  %v608_v43 = vld [vmem:[%s852_s5 + $0x48] sm:$0xff]   ;;  %v610_v45 = vld [vmem:[%s852_s5 + $0x40] sm:$0xff]   ;;  %v143_v50 = vld [vmem:[#allocation5] sm:$0x3] }
  0x28   :  { %241 = vmatprep.subr.bf16.mxu1 %v581_v11  ;;  %v609_v44 = vld [vmem:[%s852_s5 + $0x8] sm:$0xff]   ;;  %v611_v46 = vld [vmem:[%s852_s5] sm:$0xff]   ;;  %v148_v52 = vrot.slane %v143_v50, %v147_v49  ;;  %v152_v53 = vrot.slane %v143_v50, %v151_v51 }
  0x29   :  { %v512_v4 = vld [vmem:[%s853_s6] ss:$0 sm:$0xff]  ;;  %s689_s6 = smov [#allocation7]  }
  0x2a   :  { %535 = vmatpush3.bf16.msra.mxu0 %v599_v25  ;;  %s482_s3 = sshll.u32 %s689_s6, 4  ;;  %s483_s3 = int_to_ptr.vmem [resolvable:$true] %s482_s3 }
  0x2b   :  { %242 = vmatpush1.bf16.msra.mxu1 %v583_v12  ;;  %536 = vmatprep.subr.bf16.mxu0 %v600_v26  ;;  %s656_s25 = scalar_lea.vmem %s483_s3, 128  ;;  %p661_p11 = scmp.lt.s32.totalorder %s483_s3, %s483_s3 }
  0x2c   :  { %243 = vmatprep.subr.bf16.mxu1 %v584_v13  ;;  %p657_p10 = scmp.ne.s32.totalorder %s483_s3, %s656_s25  ;;  %p662_p12 = scmp.lt.s32.totalorder %s656_s25, %s656_s25 }
  0x2e   :  { %537 = vmatpush3.bf16.msra.mxu0 %v601_v27  ;;  %p663_p13 = por %p662_p12, %p661_p11 }
  0x2f   :  { %244 = vmatpush1.bf16.msra.mxu1 %v586_v14  ;;  %538 = vmatprep.subr.bf16.mxu0 %v602_v28 }
  0x30   :  { %245 = vmatprep.subr.bf16.mxu1 %v587_v15  ;;  %p664_p0 = pnand %p663_p13, %p657_p10 }
  0x32   :  { %539 = vmatpush3.bf16.msra.mxu0 %v603_v29 }
  0x33   :  { %246 = vmatpush1.bf16.msra.mxu1 %v589_v16  ;;  %540 = vmatprep.subr.bf16.mxu0 %v604_v30 }
  0x34   :  { %247 = vmatprep.subr.bf16.mxu1 %v590_v17 }
  0x36   :  { %541 = vmatpush3.bf16.msra.mxu0 %v605_v31 }
  0x37   :  { %248 = vmatpush1.bf16.msra.mxu1 %v592_v18  ;;  %542 = vmatprep.subr.bf16.mxu0 %v606_v32 }
  0x38   :  { %249 = vmatprep.subr.bf16.mxu1 %v593_v19 }
  0x3a   :  { %543 = vmatpush3.bf16.msra.mxu0 %v607_v42 }
  0x3b   :  { %250 = vmatpush1.bf16.msra.mxu1 %v595_v20  ;;  %544 = vmatprep.subr.bf16.mxu0 %v608_v43 }
  0x3e   :  { %545 = vmatpush3.bf16.msra.mxu0 %v609_v44 }
  0x3f   :  { %546 = vmatprep.subr.bf16.mxu0 %v610_v45 }
  0x42   :  { %547 = vmatpush3.bf16.msra.mxu0 %v611_v46 }
  0xe5   :  { %v117_v34 = vpop.f32.mrf.mxu0 }
  0xe6   :  { %v118_v35 = vadd.f32 %v492_v33, %v117_v34 }
  0xe7   :  { %v560_v36 = vpop.f32.mrf.mxu0 }
  0xe8   :  { %vm123_vm2 = vcmp.gt.f32.partialorder %v118_v35, 0.0  ;;  %v124_v37 = vmul.f32 0.01, %v118_v35 }
  0xe9   :  { %v120_v38 = vpop.f32.mrf.mxu0 }
  0xea   :  { %v125_v39 = vsel %vm123_vm2, %v118_v35, %v124_v37 }
  0xeb   :  { %v561_v40 = vpop.f32.mrf.mxu0  ;;  %v126_v41 = vpack.c.bf16 %v125_v39, %v125_v39 }
  0xed   :  { %268 = vmatmul.mubr.bf16.vlgmr.msra.gmra.mxu1 %v126_v41 }
 0x1ad   :  { %v269_v54 = vpop.f32.mrf.mxu1 }
 0x1ae   :  { %v270_v55 = vadd.f32 %v269_v54, %v148_v52 }
 0x1af   :  { %v271_v56 = vpop.f32.mrf.mxu1 }
 0x1b0   :  { %vm276_vm3 = vcmp.gt.f32.partialorder %v270_v55, 0.0  ;;  %v278_v57 = vmul.f32 0.01, %v270_v55  ;;  %v272_v58 = vadd.f32 %v271_v56, %v152_v53 }
 0x1b1   :  { %v273_v59 = vpop.f32.mrf.mxu1 }
 0x1b2   :  { %vm277_vm4 = vcmp.gt.f32.partialorder %v272_v58, 0.0  ;;  %v279_v60 = vmul.f32 0.01, %v272_v58  ;;  %v280_v61 = vsel %vm276_vm3, %v270_v55, %v278_v57 }
 0x1b3   :  { %v274_v62 = vpop.f32.mrf.mxu1  ;;  %v282_v1 = vpack.c.bf16 %v280_v61, %v280_v61 }
 0x1b4   :  { %v281_v63 = vsel %vm277_vm4, %v272_v58, %v279_v60 }
 0x1b5   :  { %v283_v0 = vpack.c.bf16 %v281_v63, %v281_v63 }
 0x1b7   :  { %451 = vmatprep.mubr.bf16.mxu0 %v283_v0 }
 0x1b8   :  { %452 = vmatmul.mubr.bf16.vlgmr.msra.gmra.mxu0 %v282_v1 }
 0x278   :  { %v548_v2 = vpop.f32.mrf.mxu0 }
 0x27a   :  { %v549_v3 = vpop.f32.mrf.mxu0 }
 0x27b   :  { %v550_v5 = vadd.f32 %v549_v3, %v548_v2 }
 0x27c   :  { %v551_v6 = vpop.f32.mrf.mxu0 }
 0x27d   :  { %v454_v7 = vadd.f32 %v550_v5, %v512_v4 }
 0x27e   :  { %v552_v8 = vpop.f32.mrf.mxu0 }
 0x27f   :  { %v460_v9 = vsel %vm459_vm5, %v454_v7, -inf }
 0x280   :  { %461 = vmax.xlane.f32.xlu0 %v460_v9 }
 0x309   :  { %v462_v10 = vpop.xlane.xlu0 %461 }
 0x30a   :  { %v463_v11 = vsub.f32 %v454_v7, %v462_v10 }
 0x30c   :  { %v464_v12 = vmul.f32 1.442695, %v463_v11 }
 0x30e   :  { %612 = vpow2.f32 %v464_v12 }
 0x31b   :  { %v613_v13 = vpop.eup %612 }
 0x31c   :  { %v466_v14 = vsel %vm459_vm5, %v613_v13, 0.0 }
 0x31d   :  { %467 = vadd.xlane.f32.xlu0 %v466_v14 }
 0x3a6   :  { %v468_v15 = vpop.xlane.xlu0 %467 }
 0x3a7   :  { %614 = vrcp.f32 %v468_v15 }
 0x3b4   :  { %v615_v16 = vpop.eup %614 }
 0x3b5   :  { %v470_v17 = vmul.f32 %v615_v16, %v468_v15 }
 0x3b7   :  { %v471_v18 = vsub.f32 2.0, %v470_v17 }
 0x3b9   :  { %v472_v19 = vmul.f32 %v615_v16, %v471_v18 }
 0x3bb   :  { %v473_v20 = vmul.f32 %v613_v13, %v472_v19 }
 0x3bd   :  { %v474_v21 = vadd.f32 1e-16, %v473_v20 }
 0x3bf   :  { %475 = vst.msk [vmem:[#allocation7] sm:$0xff] %vm459_vm5, %v474_v21 }
 0x3c0   :  { %667 = shalt.err (!%p664_p0)
}
 0x3c1   :  { %485 = dma.vmem_to_hbm [thread:$0]  %s483_s3, 128, %s854_s7, [#allocation4]  }
 0x3c2   :  { %680 = dma.done.wait [#allocation4], 128  }
 0x3c3   :  { %681 = vsyncadd [#allocation4], 4294967168 }
 0x3c4   :  { %489 = vsyncpa [#allocation3], 1 }
 0x3c5   :  { %490 = vsyncpa [#allocation6], 1 }
 0x3c6   :  { %491 = vsyncpa [#allocation4], 1 }

</bundles_post_ra>
